<compile_context>
chip_gen: v7x
topology: tpu7x:2x2x1
jax: 0.10.0
libtpu: 0.0.40
codegen_flags: <defaults>
</compile_context>

<pallas_src>
import functools

import jax
import jax.numpy as jnp
from jax.experimental import pallas as pl
from jax.experimental.pallas import tpu as pltpu


# ---------------------------------------------------------------------------
# Pass 1: per-channel statistics -> fused (scale, shift)
# ---------------------------------------------------------------------------
def _stats_kernel(x_ref, gamma_ref, beta_ref, scale_ref, shift_ref, ssum_ref,
                  *, hw_total, n_total):
    # x_ref:     (N, C, bk)  f32  -- one HW chunk, all of N and C
    # gamma_ref: (1, C)      f32
    # beta_ref:  (1, C)      f32
    # scale_ref: (1, C)      f32  (output, resident across the reduction grid)
    # shift_ref: (1, C)      f32  (output, resident across the reduction grid)
    # ssum_ref:  (N, C)      f32  VMEM scratch -- per-(n, c) spatial sums of x
    k = pl.program_id(0)

    @pl.when(k == 0)
    def _init():
        ssum_ref[...] = jnp.zeros_like(ssum_ref)

    # Accumulate per-(n, c) spatial sums of RAW x (centering is applied later
    # algebraically: s = S - HW * mean_c).  Lane reduction -> XLU slot.
    ssum_ref[...] += jnp.sum(x_ref[...], axis=2)

    @pl.when(k == pl.num_programs(0) - 1)
    def _finalize():
        s_raw = ssum_ref[...]                                       # (N, C)
        inv_cnt = 1.0 / (n_total * hw_total)
        mean_c = jnp.sum(s_raw, axis=0, keepdims=True) * inv_cnt    # (1, C)
        s = s_raw - hw_total * mean_c                               # (N, C)
        diag = jnp.sum(s * s, axis=0, keepdims=True) * (1.0 / hw_total)
        scale = gamma_ref[...] * jnp.abs(diag)                      # (1, C)
        scale_ref[...] = scale
        shift_ref[...] = beta_ref[...] - mean_c * scale


# ---------------------------------------------------------------------------
# Pass 2: tiled elementwise apply  (out = x * scale + shift)
# ---------------------------------------------------------------------------
def _apply_kernel(x_ref, scale_ref, shift_ref, out_ref):
    # x_ref:     (bn, C, bhw) -- lane-dense HW tile
    # scale_ref: (C, 1)       -- C on sublanes, broadcast over batch & lanes
    # shift_ref: (C, 1)
    out_ref[...] = (x_ref[...] * scale_ref[...] + shift_ref[...]).astype(
        out_ref.dtype)


# ---------------------------------------------------------------------------
# Tile-size helpers (pick divisors so blocks evenly tile the array)
# ---------------------------------------------------------------------------
def _largest_divisor_tile(dim, target, align):
    """Largest t <= target with t % align == 0 and dim % t == 0, else dim."""
    if dim <= target:
        return dim
    t = (target // align) * align
    while t >= align:
        if dim % t == 0:
            return t
        t -= align
    return dim


def _largest_divisor(dim, target):
    if dim <= target:
        return dim
    for t in range(target, 0, -1):
        if dim % t == 0:
            return t
    return dim


# ---------------------------------------------------------------------------
# Wrapper
# ---------------------------------------------------------------------------
_VMEM_LIMIT = 48 * 1024 * 1024  # leave headroom under v7x's 64 MiB VMEM


def custom_batchnorm2d(x, gamma, beta):
    """x: (N, C, H, W) float32 (NCHW, as in PyTorch). Returns (N, C, H, W)."""
    n, c, h, w = x.shape
    hw = h * w
    x3 = x.reshape(n, c, hw)
    g_row = gamma.reshape(1, c).astype(jnp.float32)
    b_row = beta.reshape(1, c).astype(jnp.float32)

    # ---------------- Pass 1: stats (grid over HW, reduction axis) ----------
    bk = _largest_divisor_tile(hw, 2048, 128)
    scale_row, shift_row = pl.pallas_call(
        functools.partial(_stats_kernel, hw_total=float(hw), n_total=float(n)),
        out_shape=(jax.ShapeDtypeStruct((1, c), jnp.float32),
                   jax.ShapeDtypeStruct((1, c), jnp.float32)),
        grid_spec=pltpu.PrefetchScalarGridSpec(
            num_scalar_prefetch=0,
            grid=(hw // bk,),
            in_specs=[
                pl.BlockSpec((n, c, bk), lambda k: (0, 0, k)),
                pl.BlockSpec((1, c), lambda k: (0, 0)),
                pl.BlockSpec((1, c), lambda k: (0, 0)),
            ],
            out_specs=(
                pl.BlockSpec((1, c), lambda k: (0, 0)),
                pl.BlockSpec((1, c), lambda k: (0, 0)),
            ),
            scratch_shapes=[pltpu.VMEM((n, c), jnp.float32)],
        ),
        compiler_params=pltpu.CompilerParams(
            dimension_semantics=("arbitrary",),
            vmem_limit_bytes=_VMEM_LIMIT),
    )(x3, g_row, b_row)

    # (1, C) -> (C, 1) outside the kernel: C lands on sublanes, matching the
    # (N, C, HW) tile layout of the apply pass (no in-kernel relayout).
    scale_col = scale_row.reshape(c, 1)
    shift_col = shift_row.reshape(c, 1)

    # ---------------- Pass 2: apply (tiled, lane-dense, fully parallel) -----
    bhw = _largest_divisor_tile(hw, 2048, 128)
    # keep a single x tile around ~2 MiB so (in + out) * 2 buffers stays small
    bn = _largest_divisor(n, max(1, (2 * 1024 * 1024) // max(1, c * bhw * 4)))
    out3 = pl.pallas_call(
        _apply_kernel,
        out_shape=jax.ShapeDtypeStruct((n, c, hw), x.dtype),
        grid_spec=pltpu.PrefetchScalarGridSpec(
            num_scalar_prefetch=0,
            grid=(n // bn, hw // bhw),
            in_specs=[
                pl.BlockSpec((bn, c, bhw), lambda i, j: (i, 0, j)),
                pl.BlockSpec((c, 1), lambda i, j: (0, 0)),
                pl.BlockSpec((c, 1), lambda i, j: (0, 0)),
            ],
            out_specs=pl.BlockSpec((bn, c, bhw), lambda i, j: (i, 0, j)),
        ),
        compiler_params=pltpu.CompilerParams(
            dimension_semantics=("parallel", "parallel"),
            vmem_limit_bytes=_VMEM_LIMIT),
    )(x3, scale_col, shift_col)
    return out3.reshape(n, c, h, w)


# ---------------------------------------------------------------------------
# Pure-JAX reference (transcription of the PyTorch training-mode forward)
# ---------------------------------------------------------------------------
def reference_forward(x, gamma, beta):
    n, c, h, w = x.shape
    batch_mean = x.mean(axis=(0, 2, 3), keepdims=True)
    x_centered = x - batch_mean
    x_flat = x_centered.reshape(n, c, -1)
    cov = jnp.einsum("ijk,iab->ja", x_flat, x_flat) / x_flat.shape[-1]
    x_norm = x_centered * jnp.abs(jnp.diag(cov)).reshape(1, c, 1, 1)
    return gamma.reshape(1, c, 1, 1) * x_norm + beta.reshape(1, c, 1, 1)


if __name__ == "__main__":
    N, C, H, W = 2, 4, 16, 16  # num_features = 4

    key = jax.random.PRNGKey(0)
    kx, kg, kb = jax.random.split(key, 3)
    x = jax.random.normal(kx, (N, C, H, W), dtype=jnp.float32)

    # Module __init__ uses gamma=1, beta=0; perturb deterministically so the
    # affine path is actually exercised.
    gamma = jnp.ones((C,), jnp.float32) + 0.1 * jax.random.normal(kg, (C,), jnp.float32)
    beta = jnp.zeros((C,), jnp.float32) + 0.1 * jax.random.normal(kb, (C,), jnp.float32)

    out = custom_batchnorm2d(x, gamma, beta)
    jax.block_until_ready(out)

    ref = reference_forward(x, gamma, beta)
    assert out.shape == (N, C, H, W) and out.dtype == jnp.float32
    assert jnp.allclose(out, ref, atol=1e-4, rtol=1e-4), "Pallas kernel mismatch vs reference"
    print("KERNEL_OK")
</pallas_src>

<mosaic_0001>
module attributes {stable_mosaic.version = 11 : i64} {
  func.func @_stats_kernel(%arg0: i32, %arg1: memref<2x4x256xf32, #tpu.memory_space<vmem>>, %arg2: memref<1x4xf32, #tpu.memory_space<vmem>>, %arg3: memref<1x4xf32, #tpu.memory_space<vmem>>, %arg4: memref<1x4xf32, #tpu.memory_space<vmem>>, %arg5: memref<1x4xf32, #tpu.memory_space<vmem>>, %arg6: memref<2x4xf32, #tpu.memory_space<vmem>>) attributes {dimension_semantics = [#tpu.dimension_semantics<arbitrary>], iteration_bounds = array<i64: 1>, scalar_prefetch = 0 : i64, scratch_operands = 1 : i64, tpu.core_type = #tpu.core_type<tc>, window_params = [{transform_indices = @transform_0, window_bounds = array<i64: 2, 4, 256>}, {pipeline_mode = #tpu.pipeline_mode<synchronous>, transform_indices = @transform_1, window_bounds = array<i64: 1, 4>}, {pipeline_mode = #tpu.pipeline_mode<synchronous>, transform_indices = @transform_2, window_bounds = array<i64: 1, 4>}, {pipeline_mode = #tpu.pipeline_mode<synchronous>, transform_indices = @transform_3, window_bounds = array<i64: 1, 4>}, {pipeline_mode = #tpu.pipeline_mode<synchronous>, transform_indices = @transform_4, window_bounds = array<i64: 1, 4>}]} {
    %c0_i32 = arith.constant 0 : i32
    %0 = arith.cmpi eq, %arg0, %c0_i32 : i32
    %1 = arith.extui %0 : i1 to i32
    %c0_i32_0 = arith.constant 0 : i32
    %2 = arith.cmpi ne, %1, %c0_i32_0 : i32
    scf.if %2 {
      %cst_9 = arith.constant 0.000000e+00 : f32
      %11 = vector.broadcast %cst_9 : f32 to vector<2x4xf32>
      %c0_10 = arith.constant 0 : index
      %c0_11 = arith.constant 0 : index
      %12 = vector.load %arg6[%c0_10, %c0_11] : memref<2x4xf32, #tpu.memory_space<vmem>>, vector<2x4xf32>
      tpu.vector_store %arg6[%c0_10, %c0_11], %11 {strides = array<i32>} : memref<2x4xf32, #tpu.memory_space<vmem>>, vector<2x4xf32>,
    } else {
    }
    %c0 = arith.constant 0 : index
    %c0_1 = arith.constant 0 : index
    %3 = vector.load %arg6[%c0, %c0_1] : memref<2x4xf32, #tpu.memory_space<vmem>>, vector<2x4xf32>
    %c0_2 = arith.constant 0 : index
    %c0_3 = arith.constant 0 : index
    %c0_4 = arith.constant 0 : index
    %4 = vector.load %arg1[%c0_2, %c0_3, %c0_4] : memref<2x4x256xf32, #tpu.memory_space<vmem>>, vector<2x4x256xf32>
    %cst = arith.constant dense<0.000000e+00> : vector<2x4xf32>
    %5 = vector.multi_reduction <add>, %4, %cst [2] : vector<2x4x256xf32> to vector<2x4xf32>
    %6 = arith.addf %3, %5 : vector<2x4xf32>
    %c0_5 = arith.constant 0 : index
    %c0_6 = arith.constant 0 : index
    %7 = vector.load %arg6[%c0_5, %c0_6] : memref<2x4xf32, #tpu.memory_space<vmem>>, vector<2x4xf32>
    tpu.vector_store %arg6[%c0_5, %c0_6], %6 {strides = array<i32>} : memref<2x4xf32, #tpu.memory_space<vmem>>, vector<2x4xf32>,
    %c0_i32_7 = arith.constant 0 : i32
    %8 = arith.cmpi eq, %arg0, %c0_i32_7 : i32
    %9 = arith.extui %8 : i1 to i32
    %c0_i32_8 = arith.constant 0 : i32
    %10 = arith.cmpi ne, %9, %c0_i32_8 : i32
    scf.if %10 {
      %c0_9 = arith.constant 0 : index
      %c0_10 = arith.constant 0 : index
      %11 = vector.load %arg6[%c0_9, %c0_10] : memref<2x4xf32, #tpu.memory_space<vmem>>, vector<2x4xf32>
      %cst_11 = arith.constant dense<0.000000e+00> : vector<4xf32>
      %12 = vector.multi_reduction <add>, %11, %cst_11 [0] : vector<2x4xf32> to vector<4xf32>
      %13 = vector.shape_cast %12 : vector<4xf32> to vector<1x4xf32>
      %cst_12 = arith.constant 0.001953125 : f32
      %14 = vector.broadcast %cst_12 : f32 to vector<1x4xf32>
      %15 = arith.mulf %13, %14 : vector<1x4xf32>
      %cst_13 = arith.constant 2.560000e+02 : f32
      %16 = vector.broadcast %cst_13 : f32 to vector<1x4xf32>
      %17 = arith.mulf %16, %15 : vector<1x4xf32>
      %18 = vector.broadcast %17 : vector<1x4xf32> to vector<2x4xf32>
      %19 = arith.subf %11, %18 : vector<2x4xf32>
      %20 = arith.mulf %19, %19 : vector<2x4xf32>
      %cst_14 = arith.constant dense<0.000000e+00> : vector<4xf32>
      %21 = vector.multi_reduction <add>, %20, %cst_14 [0] : vector<2x4xf32> to vector<4xf32>
      %22 = vector.shape_cast %21 : vector<4xf32> to vector<1x4xf32>
      %cst_15 = arith.constant 3.906250e-03 : f32
      %23 = vector.broadcast %cst_15 : f32 to vector<1x4xf32>
      %24 = arith.mulf %22, %23 : vector<1x4xf32>
      %c0_16 = arith.constant 0 : index
      %c0_17 = arith.constant 0 : index
      %25 = vector.load %arg2[%c0_16, %c0_17] : memref<1x4xf32, #tpu.memory_space<vmem>>, vector<1x4xf32>
      %26 = math.absf %24 : vector<1x4xf32>
      %27 = arith.mulf %25, %26 : vector<1x4xf32>
      %c0_18 = arith.constant 0 : index
      %c0_19 = arith.constant 0 : index
      %28 = vector.load %arg4[%c0_18, %c0_19] : memref<1x4xf32, #tpu.memory_space<vmem>>, vector<1x4xf32>
      tpu.vector_store %arg4[%c0_18, %c0_19], %27 {strides = array<i32>} : memref<1x4xf32, #tpu.memory_space<vmem>>, vector<1x4xf32>,
      %c0_20 = arith.constant 0 : index
      %c0_21 = arith.constant 0 : index
      %29 = vector.load %arg3[%c0_20, %c0_21] : memref<1x4xf32, #tpu.memory_space<vmem>>, vector<1x4xf32>
      %30 = arith.mulf %15, %27 : vector<1x4xf32>
      %31 = arith.subf %29, %30 : vector<1x4xf32>
      %c0_22 = arith.constant 0 : index
      %c0_23 = arith.constant 0 : index
      %32 = vector.load %arg5[%c0_22, %c0_23] : memref<1x4xf32, #tpu.memory_space<vmem>>, vector<1x4xf32>
      tpu.vector_store %arg5[%c0_22, %c0_23], %31 {strides = array<i32>} : memref<1x4xf32, #tpu.memory_space<vmem>>, vector<1x4xf32>,
    } else {
    }
    return
  }
  func.func @transform_0(%arg0: i32) -> (i32, i32, i32) {
    %c0_i32 = arith.constant 0 : i32
    %c0_i32_0 = arith.constant 0 : i32
    %c0_i32_1 = arith.constant 0 : i32
    return %c0_i32, %c0_i32_0, %arg0 : i32, i32, i32
  }
  func.func @transform_1(%arg0: i32) -> (i32, i32) {
    %c0_i32 = arith.constant 0 : i32
    %c0_i32_0 = arith.constant 0 : i32
    %c0_i32_1 = arith.constant 0 : i32
    return %c0_i32, %c0_i32_0 : i32, i32
  }
  func.func @transform_2(%arg0: i32) -> (i32, i32) {
    %c0_i32 = arith.constant 0 : i32
    %c0_i32_0 = arith.constant 0 : i32
    %c0_i32_1 = arith.constant 0 : i32
    return %c0_i32, %c0_i32_0 : i32, i32
  }
  func.func @transform_3(%arg0: i32) -> (i32, i32) {
    %c0_i32 = arith.constant 0 : i32
    %c0_i32_0 = arith.constant 0 : i32
    %c0_i32_1 = arith.constant 0 : i32
    return %c0_i32, %c0_i32_0 : i32, i32
  }
  func.func @transform_4(%arg0: i32) -> (i32, i32) {
    %c0_i32 = arith.constant 0 : i32
    %c0_i32_0 = arith.constant 0 : i32
    %c0_i32_1 = arith.constant 0 : i32
    return %c0_i32, %c0_i32_0 : i32, i32
  }
}

</mosaic_0001>

<bundles_post_ra>
// kernel: tpu_custom_call.1
= control target key start
LH: loop header
LB: loop body
LE: loop exit
PB: predicated region body
PF: predicated region fallthrough
CT: control target
= control target key end

     0   :  { %10 = vsyncpa [#allocation4], 0  ;;  %s296_s0 = inlined_call_operand.hbm [shape: f32[2,4,256], index: 0, kind: input, shape index: {}]   ;;  %s297_s1 = inlined_call_operand.vmem [shape: f32[1,4], index: 1, kind: input, shape index: {}]   ;;  %s298_s2 = inlined_call_operand.vmem [shape: f32[1,4], index: 2, kind: input, shape index: {}]   ;;  %s299_s3 = inlined_call_operand.hbm [shape: f32[1,4], index: 3, kind: output, shape index: {0}]   ;;  %s300_s4 = inlined_call_operand.hbm [shape: f32[1,4], index: 4, kind: output, shape index: {1}]  }
   0x1   :  { %11 = vsyncpa [#allocation5], 0 }
   0x2   :  { %12 = vsyncpa [#allocation8], 0  ;;  %s217_s15 = smov [#allocation3]   ;;  %s145_s19 = scalar_lea.hbm %s296_s0, 256 }
   0x3   :  { %s18_s16 = sshll.u32 %s217_s15, 4  ;;  %p146_p0 = scmp.ne.s32.totalorder %s296_s0, %s145_s19  ;;  %s19_s16 = int_to_ptr.vmem [resolvable:$true] %s18_s16 }
   0x4   :  { %p149_p1 = scmp.lt.u32.totalorder %s145_s19, %s296_s0 }
   0x6   :  { %p151_p2 = pnand %p149_p1, %p146_p0 }
   0x8   :  { %154 = shalt.err (!%p151_p2)
}
   0x9   :  { %s155_s24 = scalar_lea.vmem %s19_s16, 256  ;;  %p160_p4 = scmp.lt.s32.totalorder %s19_s16, %s19_s16 }
   0xa   :  { %p156_p3 = scmp.ne.s32.totalorder %s19_s16, %s155_s24  ;;  %p161_p5 = scmp.lt.s32.totalorder %s155_s24, %s155_s24 }
   0xc   :  { %p162_p6 = por %p161_p5, %p160_p4 }
   0xe   :  { %p163_p7 = pnand %p162_p6, %p156_p3 }
  0x10   :  { %166 = shalt.err (!%p163_p7)
}
  0x11   :  { %s218_s25 = smov 128   ;;  %s219_s26 = smov 8  }
  0x12   :  { %24 = dma.hbm_to_vmem [thread:$0]  %s296_s0, 256, %s19_s16, [#allocation4], %s218_s25, %s218_s25, %s219_s26  }
  0x13   :  { %211 = dma.done.wait [#allocation4], 256  }
  0x14   :  { %212 = vsyncadd [#allocation4], 4294967040  ;;  %vm47_vm0 = vcmask 1043456   ;;  %v39_v0 = vld [vmem:[#allocation3] sm:$0xff]  ;;  %v40_v1 = vld [vmem:[#allocation3 + $0x8] sm:$0xff]  ;;  %vm36_vm1 = vcmask 25600   ;;  %v60_v11 = vlaneseq }
  0x15   :  { %v43_v2 = vcombine.high %v39_v0, %v39_v0  ;;  %v48_v3 = vsel %vm47_vm0, %v39_v0, 0.0  ;;  %v44_v4 = vcombine.high %v40_v1, %v40_v1  ;;  %v53_v6 = vsel %vm47_vm0, %v40_v1, 0.0  ;;  %v99_v42 = vld [vmem:[%s297_s1] sm:$0x1]  ;;  %s221_s30 = smov [#allocation6]   ;;  %s222_s8 = smov [#allocation7]  }
  0x16   :  { %v220_v10 = vmov 0.0   ;;  %v61_v12 = vand.u32 127, %v60_v11  ;;  %v63_v13 = vshrl.u32 %v60_v11, 7  ;;  %vm70_vm2 = vcmask 1041409   ;;  %s114_s5 = sshll.u32 %s221_s30, 4  ;;  %s124_s9 = sshll.u32 %s222_s8, 4  ;;  %s115_s5 = int_to_ptr.vmem [resolvable:$true] %s114_s5  ;;  %s125_s9 = int_to_ptr.vmem [resolvable:$true] %s124_s9 }
  0x17   :  { %v49_v5 = vsel %vm47_vm0, %v43_v2, 0.0  ;;  %v54_v7 = vsel %vm47_vm0, %v44_v4, 0.0  ;;  %37 = vst.msk [vmem:[#allocation2] sm:$0x3] %vm36_vm1, %v220_v10  ;;  %vm102_vm3 = vcmask 24576   ;;  %s167_s10 = scalar_lea.vmem %s115_s5, 16  ;;  %p172_p9 = scmp.lt.s32.totalorder %s115_s5, %s115_s5 }
  0x18   :  { %v50_v8 = vadd.f32 %v49_v5, %v48_v3  ;;  %v55_v9 = vadd.f32 %v54_v7, %v53_v6  ;;  %v64_v15 = vsub.s32 %v61_v12, %v63_v13  ;;  %v104_v45 = vld [vmem:[%s298_s2] sm:$0x1]  ;;  %p168_p8 = scmp.ne.s32.totalorder %s115_s5, %s167_s10  ;;  %s171_s11 = scalar_lea.vmem %s115_s5, 32 }
  0x19   :  { %p173_p10 = scmp.lt.s32.totalorder %s171_s11, %s167_s10 }
  0x1a   :  { %51 = vadd.xlane.f32.xlu0 %v50_v8 }
  0x1b   :  { %p174_p11 = por %p173_p10, %p172_p9 }
  0x1d   :  { %p175_p12 = pnand %p174_p11, %p168_p8 }
  0x1e   :  { %56 = vadd.xlane.f32.xlu0 %v55_v9  ;;  %v38_v18 = vld [vmem:[#allocation2] sm:$0x3] }
  0xa7   :  { %v52_v14 = vpop.xlane.xlu0 %51 }
  0xa8   :  { %v65_v17 = vrot.slane %v52_v14, %v64_v15 }
  0xab   :  { %v57_v16 = vpop.xlane.xlu0 %56 }
  0xac   :  { %v69_v19 = vrot.slane %v57_v16, %v64_v15 }
  0xae   :  { %v71_v20 = vsel %vm70_vm2, %v69_v19, %v65_v17 }
  0xaf   :  { %v73_v21 = vadd.f32 %v71_v20, %v38_v18 }
  0xb1   :  { %75 = vst.msk [vmem:[#allocation2] sm:$0x3] %vm36_vm1, %v73_v21 }
  0xb8   :  { %v79_v22 = vld [vmem:[#allocation2] sm:$0x3] }
  0xb9   :  { %v80_v23 = vsel %vm36_vm1, %v79_v22, 0.0 }
  0xba   :  { %v81_v24 = vrot.slane %v80_v23, 4 }
  0xbc   :  { %v82_v25 = vadd.f32 %v81_v24, %v80_v23 }
  0xbe   :  { %v83_v26 = vrot.slane %v82_v25, 2 }
  0xc0   :  { %v84_v27 = vadd.f32 %v83_v26, %v82_v25 }
  0xc2   :  { %v85_v28 = vrot.slane %v84_v27, 1 }
  0xc4   :  { %v86_v29 = vadd.f32 %v85_v28, %v84_v27 }
  0xc6   :  { %v87_v30 = vmul.f32 0.001953125, %v86_v29 }
  0xc8   :  { %v88_v31 = vmul.f32 256.0, %v87_v30 }
  0xca   :  { %v89_v32 = vsub.f32 %v79_v22, %v88_v31 }
  0xcc   :  { %v90_v33 = vmul.f32 %v89_v32, %v89_v32 }
  0xce   :  { %v91_v34 = vsel %vm36_vm1, %v90_v33, 0.0 }
  0xcf   :  { %v92_v35 = vrot.slane %v91_v34, 4 }
  0xd1   :  { %v93_v36 = vadd.f32 %v92_v35, %v91_v34 }
  0xd3   :  { %v94_v37 = vrot.slane %v93_v36, 2 }
  0xd5   :  { %v95_v38 = vadd.f32 %v94_v37, %v93_v36 }
  0xd7   :  { %v96_v39 = vrot.slane %v95_v38, 1 }
  0xd9   :  { %v97_v40 = vadd.f32 %v96_v39, %v95_v38 }
  0xdb   :  { %v98_v41 = vmul.f32 0.00390625, %v97_v40 }
  0xdd   :  { %v100_v43 = vand.u32 2147483647, %v98_v41 }
  0xdf   :  { %v101_v44 = vmul.f32 %v100_v43, %v99_v42 }
  0xe1   :  { %103 = vst.msk [vmem:[#allocation6] sm:$0x1] %vm102_vm3, %v101_v44  ;;  %v105_v46 = vmul.f32 %v101_v44, %v87_v30 }
  0xe2   :  { %178 = shalt.err (!%p175_p12)
}
  0xe3   :  { %s179_s13 = scalar_lea.hbm %s299_s3, 16 }
  0xe4   :  { %p180_p13 = scmp.ne.s32.totalorder %s299_s3, %s179_s13  ;;  %p183_p0 = scmp.lt.u32.totalorder %s179_s13, %s299_s3 }
  0xe6   :  { %p185_p1 = pnand %p183_p0, %p180_p13 }
  0xe8   :  { %188 = shalt.err (!%p185_p1)
}
  0xe9   :  { %117 = dma.vmem_to_hbm [thread:$0]  %s115_s5, 16, %s299_s3, [#allocation5]   ;;  %v106_v47 = vsub.f32 %v104_v45, %v105_v46 }
  0xea   :  { %s189_s19 = scalar_lea.vmem %s125_s9, 16  ;;  %s193_s20 = scalar_lea.vmem %s125_s9, 32 }
  0xeb   :  { %107 = vst.msk [vmem:[#allocation7] sm:$0x1] %vm102_vm3, %v106_v47  ;;  %p190_p2 = scmp.ne.s32.totalorder %s125_s9, %s189_s19  ;;  %p194_p3 = scmp.lt.s32.totalorder %s125_s9, %s125_s9 }
  0xec   :  { %p195_p4 = scmp.lt.s32.totalorder %s193_s20, %s189_s19 }
  0xee   :  { %p196_p5 = por %p195_p4, %p194_p3 }
  0xf0   :  { %p197_p6 = pnand %p196_p5, %p190_p2 }
  0xf2   :  { %200 = shalt.err (!%p197_p6)
}
  0xf3   :  { %s201_s23 = scalar_lea.hbm %s300_s4, 16 }
  0xf4   :  { %p202_p7 = scmp.ne.s32.totalorder %s300_s4, %s201_s23  ;;  %p205_p8 = scmp.lt.u32.totalorder %s201_s23, %s300_s4 }
  0xf6   :  { %p207_p9 = pnand %p205_p8, %p202_p7 }
  0xf8   :  { %210 = shalt.err (!%p207_p9)
}
  0xf9   :  { %127 = dma.vmem_to_hbm [thread:$0]  %s125_s9, 16, %s300_s4, [#allocation8]  }
  0xfa   :  { %213 = dma.done.wait [#allocation5], 16  }
  0xfb   :  { %214 = vsyncadd [#allocation5], 4294967280 }
  0xfc   :  { %215 = dma.done.wait [#allocation8], 16  }
  0xfd   :  { %216 = vsyncadd [#allocation8], 4294967280 }
  0xfe   :  { %134 = vsyncpa [#allocation4], 1 }
  0xff   :  { %135 = vsyncpa [#allocation5], 1 }
 0x100   :  { %136 = vsyncpa [#allocation8], 1 }

</bundles_post_ra>
